<compile_context>
chip_gen: v7x
topology: tpu7x:2x2x1
jax: 0.10.0
libtpu: 0.0.40
codegen_flags: <defaults>
</compile_context>

<pallas_src>
import math

import jax
import jax.numpy as jnp
from jax.experimental import pallas as pl
from jax.experimental.pallas import tpu as pltpu

BN_EPS = 1e-5

# Cache for whether pipeline_mode=pl.Buffered(1) is accepted by this JAX/Mosaic build.
_SINGLE_BUFFER_OK = True


def _round_up(x, m):
    return (x + m - 1) // m * m


def _ceil_div(a, b):
    return -(-a // b)


# --------------------------------------------------------------------------- #
# Kernels
# --------------------------------------------------------------------------- #
def _cltop_two_matmul_kernel(x_ref, w1_ref, b1_ref, w2_ref, b2_ref, out_ref,
                             h_ref):
    """Grid = (batch_tiles, class_tiles); class axis innermost & 'arbitrary'.

    At j == 0 compute the BN-folded bottleneck activation h for this batch tile
    into VMEM scratch (bf16); reuse it for every class tile j.
    """
    @pl.when(pl.program_id(1) == 0)
    def _():
        xb = x_ref[...].astype(jnp.bfloat16)          # free if already bf16
        h = jnp.dot(xb, w1_ref[...], preferred_element_type=jnp.float32)
        h_ref[...] = (h + b1_ref[...]).astype(jnp.bfloat16)

    out = jnp.dot(h_ref[...], w2_ref[...],
                  preferred_element_type=jnp.float32) + b2_ref[...]
    out_ref[...] = out.astype(out_ref.dtype)


def _cltop_fused_affine_kernel(x_ref, w_ref, b_ref, out_ref):
    """Pre-composed affine map: single (TILE_N, Dp) @ (Dp, TILE_C) matmul."""
    xb = x_ref[...].astype(jnp.bfloat16)
    out = jnp.dot(xb, w_ref[...], preferred_element_type=jnp.float32) + b_ref[...]
    out_ref[...] = out.astype(out_ref.dtype)


# --------------------------------------------------------------------------- #
# One-time weight preparation (hoisted out of the per-call path)
# --------------------------------------------------------------------------- #
def prepare_cltop_params(params, *, precompose=None, tile_c=2048):
    """Fold eval-mode BN into the first linear, pick the kernel variant, pad/cast.

    Returns a dict of padded bf16/f32 constants + tiling metadata. Call once and
    reuse across forwards (these are constants for inference).
    """
    w1 = jnp.asarray(params["w1"], jnp.float32)          # (B, D)
    b1 = jnp.asarray(params["b1"], jnp.float32)          # (B,)
    gamma = jnp.asarray(params["bn_gamma"], jnp.float32)
    beta = jnp.asarray(params["bn_beta"], jnp.float32)
    mean = jnp.asarray(params["bn_mean"], jnp.float32)
    var = jnp.asarray(params["bn_var"], jnp.float32)
    w2 = jnp.asarray(params["w2"], jnp.float32)           # (C, B)
    b2 = jnp.asarray(params["b2"], jnp.float32)           # (C,)

    bnum, d = w1.shape
    c = w2.shape[0]

    inv_std = jax.lax.rsqrt(var + BN_EPS)
    scale = gamma * inv_std                                # (B,)
    w1_eff = w1.T * scale[None, :]                         # (D, B)  BN folded
    b1_eff = (b1 - mean) * scale + beta                    # (B,)
    w2_t = w2.T                                            # (B, C)

    dp = _round_up(d, 128)
    bp = _round_up(bnum, 128)
    cp = _round_up(c, 128)

    if precompose is None:
        # Single matmul is cheaper (FLOPs and weight bytes) iff cp*(dp-bp) < dp*bp.
        precompose = cp * (dp - bp) < dp * bp

    # Class-dimension tiling: split cp into num_j near-equal 128-aligned tiles.
    num_j = max(1, _ceil_div(cp, tile_c))
    tile_c_eff = _round_up(_ceil_div(cp, num_j), 128)
    cp_pad = tile_c_eff * num_j

    if precompose:
        # Compose the whole affine map in f32 BEFORE the bf16 cast.
        w_full = w1_eff @ w2_t                             # (D, C) f32
        b_full = b1_eff @ w2_t + b2                        # (C,)  f32
        w_p = jnp.zeros((dp, cp_pad), jnp.bfloat16).at[:d, :c].set(
            w_full.astype(jnp.bfloat16))
        b_p = jnp.zeros((1, cp_pad), jnp.float32).at[:, :c].set(b_full[None, :])
        return dict(mode="fused", w=w_p, b=b_p,
                    d=d, c=c, dp=dp, bp=bp, cp=cp_pad,
                    tile_c=tile_c_eff, num_j=num_j)

    w1_p = jnp.zeros((dp, bp), jnp.bfloat16).at[:d, :bnum].set(
        w1_eff.astype(jnp.bfloat16))
    b1_p = jnp.zeros((1, bp), jnp.float32).at[:, :bnum].set(b1_eff[None, :])
    w2_p = jnp.zeros((bp, cp_pad), jnp.bfloat16).at[:bnum, :c].set(
        w2_t.astype(jnp.bfloat16))
    b2_p = jnp.zeros((1, cp_pad), jnp.float32).at[:, :c].set(b2[None, :])
    return dict(mode="two_matmul", w1=w1_p, b1=b1_p, w2=w2_p, b2=b2_p,
                d=d, c=c, dp=dp, bp=bp, cp=cp_pad,
                tile_c=tile_c_eff, num_j=num_j)


def _pick_vmem_limit(bytes_needed):
    """Scoped-VMEM limit with headroom, capped per-generation (v7x has 64 MiB/TC)."""
    try:
        cap = int(pltpu.get_tpu_info().vmem_capacity_bytes)
    except Exception:  # pragma: no cover - conservative default
        cap = 128 * 2**20
    ceiling = int(0.75 * cap)                 # ~48 MiB on v7x, ~96 MiB on v5e/v6e
    want = int(1.5 * bytes_needed) + (4 << 20)
    return max(16 << 20, min(want, ceiling))


# --------------------------------------------------------------------------- #
# Forward
# --------------------------------------------------------------------------- #
def cltop_forward(x, prepared, *, tile_n=512, out_dtype=jnp.float32):
    """x: (N, input_dim) float32. prepared: output of prepare_cltop_params()."""
    global _SINGLE_BUFFER_OK

    x = jnp.asarray(x, jnp.float32)
    n, d = x.shape
    assert d == prepared["d"], (d, prepared["d"])

    dp, bp, cp = prepared["dp"], prepared["bp"], prepared["cp"]
    tile_c, num_j = prepared["tile_c"], prepared["num_j"]
    c = prepared["c"]

    # Batch tiling: multiple of 16 (bf16 sublane packing), shrunk adaptively so we
    # never pad a small/ragged batch up to a full 512-row tile.
    num_i = max(1, _ceil_div(n, tile_n))
    tile_n_eff = _round_up(_ceil_div(n, num_i), 16)
    n_pad = tile_n_eff * num_i

    if n_pad == n and dp == d:
        # Direct feed: no pad/cast materialization pass over x; cast in-kernel.
        x_in = x
    else:
        x_in = jnp.zeros((n_pad, dp), jnp.bfloat16).at[:n, :d].set(
            x.astype(jnp.bfloat16))

    out_b = jnp.dtype(out_dtype).itemsize
    x_b = jnp.dtype(x_in.dtype).itemsize

    # Conservative (double-buffered everywhere) VMEM estimate.
    if prepared["mode"] == "fused":
        resident_b = 2 * (dp * tile_c * 2 + tile_c * 4)
        h_b = 0
    else:
        resident_b = 2 * (dp * bp * 2 + bp * 4 + bp * tile_c * 2 + tile_c * 4)
        h_b = tile_n_eff * bp * 2
    vmem_need = (2 * tile_n_eff * dp * x_b + 2 * tile_n_eff * tile_c * out_b
                 + h_b + resident_b)
    vmem_limit = _pick_vmem_limit(vmem_need)

    out_shape = jax.ShapeDtypeStruct((n_pad, cp), out_dtype)
    x_spec = pl.BlockSpec((tile_n_eff, dp), lambda i, j: (i, 0))
    out_spec = pl.BlockSpec((tile_n_eff, tile_c), lambda i, j: (i, j))

    def _call(single_buffer):
        # Constant-index (fully resident) operands don't need a second buffer.
        res_mode = pl.Buffered(1) if single_buffer else None
        cls_mode = pl.Buffered(1) if (single_buffer and num_j == 1) else None

        if prepared["mode"] == "fused":
            kernel = _cltop_fused_affine_kernel
            in_specs = [
                x_spec,
                pl.BlockSpec((dp, tile_c), lambda i, j: (0, j),
                             pipeline_mode=cls_mode),
                pl.BlockSpec((1, tile_c), lambda i, j: (0, j),
                             pipeline_mode=cls_mode),
            ]
            scratch = []
            dims = ("parallel", "parallel")
            flops = 2 * n_pad * dp * cp
            args = (x_in, prepared["w"], prepared["b"])
        else:
            kernel = _cltop_two_matmul_kernel
            in_specs = [
                x_spec,
                pl.BlockSpec((dp, bp), lambda i, j: (0, 0),
                             pipeline_mode=res_mode),
                pl.BlockSpec((1, bp), lambda i, j: (0, 0),
                             pipeline_mode=res_mode),
                pl.BlockSpec((bp, tile_c), lambda i, j: (0, j),
                             pipeline_mode=cls_mode),
                pl.BlockSpec((1, tile_c), lambda i, j: (0, j),
                             pipeline_mode=cls_mode),
            ]
            scratch = [pltpu.VMEM((tile_n_eff, bp), jnp.bfloat16)]
            # h scratch carried across the class axis -> keep it "arbitrary".
            dims = ("parallel", "arbitrary")
            flops = 2 * n_pad * (dp * bp + bp * cp)
            args = (x_in, prepared["w1"], prepared["b1"],
                    prepared["w2"], prepared["b2"])

        bytes_accessed = int(sum(int(a.size) * jnp.dtype(a.dtype).itemsize
                                 for a in args) + n_pad * cp * out_b)

        return pl.pallas_call(
            kernel,
            out_shape=out_shape,
            grid_spec=pltpu.PrefetchScalarGridSpec(
                num_scalar_prefetch=0,
                grid=(num_i, num_j),
                in_specs=in_specs,
                out_specs=out_spec,
                scratch_shapes=scratch,
            ),
            compiler_params=pltpu.CompilerParams(
                dimension_semantics=dims,
                vmem_limit_bytes=vmem_limit,
            ),
            cost_estimate=pl.CostEstimate(
                flops=flops, transcendentals=0, bytes_accessed=bytes_accessed),
        )(*args)

    if _SINGLE_BUFFER_OK:
        try:
            out_p = _call(True)
        except Exception:
            # pipeline_mode=pl.Buffered(1) not accepted by this build; fall back.
            _SINGLE_BUFFER_OK = False
            out_p = _call(False)
    else:
        out_p = _call(False)

    return out_p[:n, :c]


# --------------------------------------------------------------------------- #
# Parameter init matching weights_init_kaiming / weights_init_classifier
# --------------------------------------------------------------------------- #
def init_cltop_params(key, input_dim, class_num, num_bottleneck=512):
    k1, k2, k3 = jax.random.split(key, 3)
    # Linear(input_dim, num_bottleneck): kaiming_normal_, a=0, mode='fan_out'
    #   -> std = sqrt(2 / num_bottleneck); bias = 0
    std1 = math.sqrt(2.0 / num_bottleneck)
    w1 = std1 * jax.random.normal(k1, (num_bottleneck, input_dim), jnp.float32)
    b1 = jnp.zeros((num_bottleneck,), jnp.float32)
    # BatchNorm1d(num_bottleneck): weight ~ N(1, 0.02), bias = 0
    bn_gamma = 1.0 + 0.02 * jax.random.normal(k2, (num_bottleneck,), jnp.float32)
    bn_beta = jnp.zeros((num_bottleneck,), jnp.float32)
    bn_mean = jnp.zeros((num_bottleneck,), jnp.float32)
    bn_var = jnp.ones((num_bottleneck,), jnp.float32)
    # Linear(num_bottleneck, class_num): weight ~ N(0, 0.001), bias = 0
    w2 = 0.001 * jax.random.normal(k3, (class_num, num_bottleneck), jnp.float32)
    b2 = jnp.zeros((class_num,), jnp.float32)
    return dict(w1=w1, b1=b1, bn_gamma=bn_gamma, bn_beta=bn_beta,
                bn_mean=bn_mean, bn_var=bn_var, w2=w2, b2=b2)


if __name__ == "__main__":
    # Small shapes consistent with the module: x is (batch, input_dim)
    batch, input_dim, num_bottleneck, class_num = 8, 32, 64, 16

    key = jax.random.PRNGKey(0)
    k_x, k_p = jax.random.split(key)
    x = jax.random.normal(k_x, (batch, input_dim), jnp.float32)
    params = init_cltop_params(k_p, input_dim, class_num, num_bottleneck)

    # Reference in plain f32 JAX (eval-mode semantics). Kernel uses bf16
    # weights/activations with f32 accumulation -> loosened tolerance.
    h_ref = x @ params["w1"].T + params["b1"]
    h_ref = ((h_ref - params["bn_mean"]) / jnp.sqrt(params["bn_var"] + BN_EPS)
             * params["bn_gamma"] + params["bn_beta"])
    out_ref = h_ref @ params["w2"].T + params["b2"]

    # Path 1: auto mode (pre-composed single-matmul for this small class head).
    prep_auto = prepare_cltop_params(params)
    out_auto = jax.block_until_ready(cltop_forward(x, prep_auto))
    assert out_auto.shape == (batch, class_num), out_auto.shape
    assert out_auto.dtype == jnp.float32
    assert jnp.allclose(out_auto, out_ref, atol=3e-3, rtol=3e-2), (
        float(jnp.max(jnp.abs(out_auto - out_ref))))

    # Path 2: explicit two-matmul, class-tiled kernel (used for large heads).
    prep_two = prepare_cltop_params(params, precompose=False)
    out_two = jax.block_until_ready(cltop_forward(x, prep_two))
    assert out_two.shape == (batch, class_num), out_two.shape
    assert out_two.dtype == jnp.float32
    assert jnp.allclose(out_two, out_ref, atol=3e-3, rtol=3e-2), (
        float(jnp.max(jnp.abs(out_two - out_ref))))

    # Optional bf16 output path (bandwidth lever on v5e/v6e).
    out_bf16 = jax.block_until_ready(
        cltop_forward(x, prep_two, out_dtype=jnp.bfloat16))
    assert out_bf16.shape == (batch, class_num)
    assert out_bf16.dtype == jnp.bfloat16
    assert jnp.allclose(out_bf16.astype(jnp.float32), out_ref,
                        atol=1e-2, rtol=1e-1)

    print("KERNEL_OK")
</pallas_src>

<mosaic_0001>
module attributes {stable_mosaic.version = 11 : i64} {
  func.func @_cltop_fused_affine_kernel(%arg0: i32, %arg1: i32, %arg2: memref<16x128xbf16, #tpu.memory_space<vmem>>, %arg3: memref<128x128xbf16, #tpu.memory_space<vmem>>, %arg4: memref<1x128xf32, #tpu.memory_space<vmem>>, %arg5: memref<16x128xf32, #tpu.memory_space<vmem>>) attributes {dimension_semantics = [#tpu.dimension_semantics<parallel>, #tpu.dimension_semantics<parallel>], iteration_bounds = array<i64: 1, 1>, scalar_prefetch = 0 : i64, scratch_operands = 0 : i64, tpu.core_type = #tpu.core_type<tc>, window_params = [{transform_indices = @transform_0, window_bounds = array<i64: 16, 128>}, {pipeline_mode = #tpu.pipeline_mode<synchronous>, transform_indices = @transform_1, window_bounds = array<i64: 128, 128>}, {pipeline_mode = #tpu.pipeline_mode<synchronous>, transform_indices = @transform_2, window_bounds = array<i64: 1, 128>}, {transform_indices = @transform_3, window_bounds = array<i64: 16, 128>}]} {
    %c0 = arith.constant 0 : index
    %c0_0 = arith.constant 0 : index
    %0 = vector.load %arg2[%c0, %c0_0] : memref<16x128xbf16, #tpu.memory_space<vmem>>, vector<16x128xbf16>
    %c0_1 = arith.constant 0 : index
    %c0_2 = arith.constant 0 : index
    %1 = vector.load %arg3[%c0_1, %c0_2] : memref<128x128xbf16, #tpu.memory_space<vmem>>, vector<128x128xbf16>
    %cst = arith.constant dense<0.000000e+00> : vector<16x128xf32>
    %2 = tpu.matmul %0, %1, %cst {dimension_numbers = #tpu.dot_dimension_numbers<[1], [0], [0], [1], [0, 0, 1, 1], [], []>} : vector<16x128xbf16>, vector<128x128xbf16>, vector<16x128xf32> -> vector<16x128xf32>
    %c0_3 = arith.constant 0 : index
    %c0_4 = arith.constant 0 : index
    %3 = vector.load %arg4[%c0_3, %c0_4] : memref<1x128xf32, #tpu.memory_space<vmem>>, vector<1x128xf32>
    %4 = vector.broadcast %3 : vector<1x128xf32> to vector<16x128xf32>
    %5 = arith.addf %2, %4 : vector<16x128xf32>
    %c0_5 = arith.constant 0 : index
    %c0_6 = arith.constant 0 : index
    %6 = vector.load %arg5[%c0_5, %c0_6] : memref<16x128xf32, #tpu.memory_space<vmem>>, vector<16x128xf32>
    tpu.vector_store %arg5[%c0_5, %c0_6], %5 {strides = array<i32>} : memref<16x128xf32, #tpu.memory_space<vmem>>, vector<16x128xf32>,
    return
  }
  func.func @transform_0(%arg0: i32, %arg1: i32) -> (i32, i32) {
    %c0_i32 = arith.constant 0 : i32
    %c0_i32_0 = arith.constant 0 : i32
    return %arg0, %c0_i32 : i32, i32
  }
  func.func @transform_1(%arg0: i32, %arg1: i32) -> (i32, i32) {
    %c0_i32 = arith.constant 0 : i32
    %c0_i32_0 = arith.constant 0 : i32
    return %c0_i32, %arg1 : i32, i32
  }
  func.func @transform_2(%arg0: i32, %arg1: i32) -> (i32, i32) {
    %c0_i32 = arith.constant 0 : i32
    %c0_i32_0 = arith.constant 0 : i32
    return %c0_i32, %arg1 : i32, i32
  }
  func.func @transform_3(%arg0: i32, %arg1: i32) -> (i32, i32) {
    %c0_i32 = arith.constant 0 : i32
    return %arg0, %arg1 : i32, i32
  }
}

module attributes {stable_mosaic.version = 11 : i64} {
  func.func @_cltop_fused_affine_kernel(%arg0: i32, %arg1: i32, %arg2: memref<16x128xbf16, #tpu.memory_space<vmem>>, %arg3: memref<128x128xbf16, #tpu.memory_space<vmem>>, %arg4: memref<1x128xf32, #tpu.memory_space<vmem>>, %arg5: memref<16x128xf32, #tpu.memory_space<vmem>>) attributes {dimension_semantics = [#tpu.dimension_semantics<parallel>, #tpu.dimension_semantics<parallel>], iteration_bounds = array<i64: 1, 1>, scalar_prefetch = 0 : i64, scratch_operands = 0 : i64, tpu.core_type = #tpu.core_type<tc>, window_params = [{transform_indices = @transform_0, window_bounds = array<i64: 16, 128>}, {transform_indices = @transform_1, window_bounds = array<i64: 128, 128>}, {transform_indices = @transform_2, window_bounds = array<i64: 1, 128>}, {transform_indices = @transform_3, window_bounds = array<i64: 16, 128>}]} {
    %c0 = arith.constant 0 : index
    %c0_0 = arith.constant 0 : index
    %0 = vector.load %arg2[%c0, %c0_0] : memref<16x128xbf16, #tpu.memory_space<vmem>>, vector<16x128xbf16>
    %c0_1 = arith.constant 0 : index
    %c0_2 = arith.constant 0 : index
    %1 = vector.load %arg3[%c0_1, %c0_2] : memref<128x128xbf16, #tpu.memory_space<vmem>>, vector<128x128xbf16>
    %cst = arith.constant dense<0.000000e+00> : vector<16x128xf32>
    %2 = tpu.matmul %0, %1, %cst {dimension_numbers = #tpu.dot_dimension_numbers<[1], [0], [0], [1], [0, 0, 1, 1], [], []>} : vector<16x128xbf16>, vector<128x128xbf16>, vector<16x128xf32> -> vector<16x128xf32>
    %c0_3 = arith.constant 0 : index
    %c0_4 = arith.constant 0 : index
    %3 = vector.load %arg4[%c0_3, %c0_4] : memref<1x128xf32, #tpu.memory_space<vmem>>, vector<1x128xf32>
    %4 = vector.broadcast %3 : vector<1x128xf32> to vector<16x128xf32>
    %5 = arith.addf %2, %4 : vector<16x128xf32>
    %c0_5 = arith.constant 0 : index
    %c0_6 = arith.constant 0 : index
    %6 = vector.load %arg5[%c0_5, %c0_6] : memref<16x128xf32, #tpu.memory_space<vmem>>, vector<16x128xf32>
    tpu.vector_store %arg5[%c0_5, %c0_6], %5 {strides = array<i32>} : memref<16x128xf32, #tpu.memory_space<vmem>>, vector<16x128xf32>,
    return
  }
  func.func @transform_0(%arg0: i32, %arg1: i32) -> (i32, i32) {
    %c0_i32 = arith.constant 0 : i32
    %c0_i32_0 = arith.constant 0 : i32
    return %arg0, %c0_i32 : i32, i32
  }
  func.func @transform_1(%arg0: i32, %arg1: i32) -> (i32, i32) {
    %c0_i32 = arith.constant 0 : i32
    %c0_i32_0 = arith.constant 0 : i32
    return %c0_i32, %arg1 : i32, i32
  }
  func.func @transform_2(%arg0: i32, %arg1: i32) -> (i32, i32) {
    %c0_i32 = arith.constant 0 : i32
    %c0_i32_0 = arith.constant 0 : i32
    return %c0_i32, %arg1 : i32, i32
  }
  func.func @transform_3(%arg0: i32, %arg1: i32) -> (i32, i32) {
    %c0_i32 = arith.constant 0 : i32
    return %arg0, %arg1 : i32, i32
  }
}

</mosaic_0001>

<bundles_post_ra>
// kernel: tpu_custom_call.1
= control target key start
LH: loop header
LB: loop body
LE: loop exit
PB: predicated region body
PF: predicated region fallthrough
CT: control target
= control target key end

     0   :  { %8 = vsyncpa [#allocation3], 0  ;;  %s381_s0 = inlined_call_operand.hbm [shape: bf16[16,128], index: 0, kind: input, shape index: {}]   ;;  %s382_s1 = inlined_call_operand.hbm [shape: bf16[128,128], index: 1, kind: input, shape index: {}]   ;;  %s383_s2 = inlined_call_operand.vmem [shape: f32[1,128], index: 2, kind: input, shape index: {}]   ;;  %s384_s3 = inlined_call_operand.hbm [shape: f32[16,128], index: 3, kind: output, shape index: {}]  }
   0x1   :  { %9 = vsyncpa [#allocation6], 0 }
   0x2   :  { %10 = vsyncpa [#allocation4], 0  ;;  %s313_s12 = smov [#allocation2]   ;;  %s241_s16 = scalar_lea.hbm %s381_s0, 128 }
   0x3   :  { %s16_s13 = sshll.u32 %s313_s12, 4  ;;  %p242_p0 = scmp.ne.s32.totalorder %s381_s0, %s241_s16  ;;  %s17_s13 = int_to_ptr.vmem [resolvable:$true] %s16_s13 }
   0x4   :  { %p245_p1 = scmp.lt.u32.totalorder %s241_s16, %s381_s0 }
   0x6   :  { %p247_p2 = pnand %p245_p1, %p242_p0 }
   0x8   :  { %250 = shalt.err (!%p247_p2)
}
   0x9   :  { %s251_s21 = scalar_lea.vmem %s17_s13, 128  ;;  %p256_p4 = scmp.lt.s32.totalorder %s17_s13, %s17_s13 }
   0xa   :  { %p252_p3 = scmp.ne.s32.totalorder %s17_s13, %s251_s21  ;;  %p257_p5 = scmp.lt.s32.totalorder %s251_s21, %s251_s21 }
   0xc   :  { %p258_p6 = por %p257_p5, %p256_p4 }
   0xe   :  { %p259_p7 = pnand %p258_p6, %p252_p3 }
  0x10   :  { %262 = shalt.err (!%p259_p7)
}
  0x11   :  { %s314_s22 = smov 64   ;;  %s315_s23 = smov 4  }
  0x12   :  { %22 = dma.hbm_to_vmem [thread:$0]  %s381_s0, 128, %s17_s13, [#allocation3], %s314_s22, %s314_s22, %s315_s23  }
  0x13   :  { %s316_s26 = smov [#allocation5]   ;;  %s263_s30 = scalar_lea.hbm %s382_s1, 1024 }
  0x14   :  { %s28_s27 = sshll.u32 %s316_s26, 4  ;;  %p264_p8 = scmp.ne.s32.totalorder %s382_s1, %s263_s30  ;;  %s29_s27 = int_to_ptr.vmem [resolvable:$true] %s28_s27 }
  0x15   :  { %p267_p9 = scmp.lt.u32.totalorder %s263_s30, %s382_s1 }
  0x17   :  { %p269_p10 = pnand %p267_p9, %p264_p8 }
  0x19   :  { %272 = shalt.err (!%p269_p10)
}
  0x1a   :  { %s273_s8 = scalar_lea.vmem %s29_s27, 1024  ;;  %p278_p12 = scmp.lt.s32.totalorder %s29_s27, %s29_s27 }
  0x1b   :  { %p274_p11 = scmp.ne.s32.totalorder %s29_s27, %s273_s8  ;;  %p279_p13 = scmp.lt.s32.totalorder %s273_s8, %s273_s8 }
  0x1d   :  { %p280_p0 = por %p279_p13, %p278_p12 }
  0x1f   :  { %p281_p1 = pnand %p280_p0, %p274_p11 }
  0x21   :  { %284 = shalt.err (!%p281_p1)
}
  0x22   :  { %34 = dma.hbm_to_vmem [thread:$0]  %s382_s1, 1024, %s29_s27, [#allocation6], %s314_s22, %s314_s22, %s315_s23  }
  0x23   :  { %307 = dma.done.wait [#allocation3], 128  }
  0x24   :  { %308 = vsyncadd [#allocation3], 4294967168 }
  0x25   :  { %309 = dma.done.wait [#allocation6], 1024  }
  0x26   :  { %310 = vsyncadd [#allocation6], 4294966272  ;;  %v317_v0 = vmov 0.0   ;;  %vm318_vm0 = vmmov 0   ;;  %v232_v1 = vld [vmem:[#allocation5] sm:$0xff]   ;;  %v233_v2 = vld [vmem:[#allocation5 + $0x8] sm:$0xff]  }
  0x27   :  { %203 = vmatprep.subr.bf16.mxu0 %v317_v0  ;;  %219 = vmatprep.mubr.msk.bf16.mxu0 %vm318_vm0, %v317_v0  ;;  %v234_v3 = vld [vmem:[#allocation5 + $0x10] sm:$0xff]   ;;  %v235_v4 = vld [vmem:[#allocation5 + $0x18] sm:$0xff]   ;;  %v236_v5 = vld [vmem:[#allocation5 + $0x20] sm:$0xff]   ;;  %s319_s11 = smov [#allocation7]  }
  0x28   :  { %204 = vmatpush3.bf16.msra.mxu0 %v232_v1  ;;  %v237_v6 = vld [vmem:[#allocation5 + $0x28] sm:$0xff]   ;;  %v238_v7 = vld [vmem:[#allocation5 + $0x30] sm:$0xff]   ;;  %v239_v8 = vld [vmem:[#allocation5 + $0x38] sm:$0xff]   ;;  %s171_s12 = sshll.u32 %s319_s11, 4  ;;  %s172_s12 = int_to_ptr.vmem [resolvable:$true] %s171_s12 }
  0x29   :  { %205 = vmatprep.subr.bf16.mxu0 %v317_v0  ;;  %v240_v9 = vld [vmem:[#allocation2] sm:$0xff]   ;;  %s285_s13 = scalar_lea.vmem %s172_s12, 256  ;;  %p290_p3 = scmp.lt.s32.totalorder %s172_s12, %s172_s12 }
  0x2a   :  { %v184_v10 = vld [vmem:[%s383_s2] ss:$0 sm:$0xff]  ;;  %p286_p2 = scmp.ne.s32.totalorder %s172_s12, %s285_s13  ;;  %p291_p4 = scmp.lt.s32.totalorder %s285_s13, %s285_s13 }
  0x2c   :  { %206 = vmatpush3.bf16.msra.mxu0 %v233_v2  ;;  %p292_p5 = por %p291_p4, %p290_p3 }
  0x2d   :  { %207 = vmatprep.subr.bf16.mxu0 %v317_v0 }
  0x2e   :  { %p293_p6 = pnand %p292_p5, %p286_p2 }
  0x30   :  { %208 = vmatpush3.bf16.msra.mxu0 %v234_v3 }
  0x31   :  { %209 = vmatprep.subr.bf16.mxu0 %v317_v0 }
  0x34   :  { %210 = vmatpush3.bf16.msra.mxu0 %v235_v4 }
  0x35   :  { %211 = vmatprep.subr.bf16.mxu0 %v317_v0 }
  0x38   :  { %212 = vmatpush3.bf16.msra.mxu0 %v236_v5 }
  0x39   :  { %213 = vmatprep.subr.bf16.mxu0 %v317_v0 }
  0x3c   :  { %214 = vmatpush3.bf16.msra.mxu0 %v237_v6 }
  0x3d   :  { %215 = vmatprep.subr.bf16.mxu0 %v317_v0 }
  0x40   :  { %216 = vmatpush3.bf16.msra.mxu0 %v238_v7 }
  0x41   :  { %217 = vmatprep.subr.bf16.mxu0 %v317_v0 }
  0x44   :  { %218 = vmatpush3.bf16.msra.mxu0 %v239_v8 }
  0x47   :  { %220 = vmatmul.mubr.bf16.vlgmr.msra.gmra.mrb[0].mxu0 %v240_v9 }
 0x11a   :  { %v157_v11 = vpop.f32.mrb[0].mxu0 }
 0x11b   :  { %v158_v12 = vadd.f32 %v184_v10, %v157_v11  ;;  %v221_v13 = vpop.f32.mrb[1].mxu0 }
 0x11c   :  { %v160_v14 = vpop.f32.mrb[2].mxu0 }
 0x11d   :  { %164 = vst [vmem:[#allocation7] sm:$0xff] %v158_v12  ;;  %v161_v15 = vadd.f32 %v184_v10, %v160_v14  ;;  %v222_v16 = vpop.f32.mrb[3].mxu0 }
 0x11f   :  { %165 = vst [vmem:[#allocation7 + $0x8] sm:$0xff] %v161_v15 }
 0x120   :  { %296 = shalt.err (!%p293_p6)
}
 0x121   :  { %s297_s15 = scalar_lea.hbm %s384_s3, 256 }
 0x122   :  { %p298_p7 = scmp.ne.s32.totalorder %s384_s3, %s297_s15  ;;  %p301_p8 = scmp.lt.u32.totalorder %s297_s15, %s384_s3 }
 0x124   :  { %p303_p9 = pnand %p301_p8, %p298_p7 }
 0x126   :  { %306 = shalt.err (!%p303_p9)
}
 0x127   :  { %s320_s20 = smov 128   ;;  %s321_s21 = smov 8  }
 0x128   :  { %177 = dma.vmem_to_hbm [thread:$0]  %s172_s12, 256, %s384_s3, [#allocation4], %s320_s20, %s320_s20, %s321_s21  }
 0x129   :  { %311 = dma.done.wait [#allocation4], 256  }
 0x12a   :  { %312 = vsyncadd [#allocation4], 4294967040 }
 0x12b   :  { %181 = vsyncpa [#allocation3], 1 }
 0x12c   :  { %182 = vsyncpa [#allocation6], 1 }
 0x12d   :  { %183 = vsyncpa [#allocation4], 1 }

// kernel: tpu_custom_call.1
= control target key start
LH: loop header
LB: loop body
LE: loop exit
PB: predicated region body
PF: predicated region fallthrough
CT: control target
= control target key end

     0   :  { %8 = vsyncpa [#allocation3], 0  ;;  %s381_s0 = inlined_call_operand.hbm [shape: bf16[16,128], index: 0, kind: input, shape index: {}]   ;;  %s382_s1 = inlined_call_operand.hbm [shape: bf16[128,128], index: 1, kind: input, shape index: {}]   ;;  %s383_s2 = inlined_call_operand.vmem [shape: f32[1,128], index: 2, kind: input, shape index: {}]   ;;  %s384_s3 = inlined_call_operand.hbm [shape: f32[16,128], index: 3, kind: output, shape index: {}]  }
   0x1   :  { %9 = vsyncpa [#allocation6], 0 }
   0x2   :  { %10 = vsyncpa [#allocation4], 0  ;;  %s313_s12 = smov [#allocation2]   ;;  %s241_s16 = scalar_lea.hbm %s381_s0, 128 }
   0x3   :  { %s16_s13 = sshll.u32 %s313_s12, 4  ;;  %p242_p0 = scmp.ne.s32.totalorder %s381_s0, %s241_s16  ;;  %s17_s13 = int_to_ptr.vmem [resolvable:$true] %s16_s13 }
   0x4   :  { %p245_p1 = scmp.lt.u32.totalorder %s241_s16, %s381_s0 }
   0x6   :  { %p247_p2 = pnand %p245_p1, %p242_p0 }
   0x8   :  { %250 = shalt.err (!%p247_p2)
}
   0x9   :  { %s251_s21 = scalar_lea.vmem %s17_s13, 128  ;;  %p256_p4 = scmp.lt.s32.totalorder %s17_s13, %s17_s13 }
   0xa   :  { %p252_p3 = scmp.ne.s32.totalorder %s17_s13, %s251_s21  ;;  %p257_p5 = scmp.lt.s32.totalorder %s251_s21, %s251_s21 }
   0xc   :  { %p258_p6 = por %p257_p5, %p256_p4 }
   0xe   :  { %p259_p7 = pnand %p258_p6, %p252_p3 }
  0x10   :  { %262 = shalt.err (!%p259_p7)
}
  0x11   :  { %s314_s22 = smov 64   ;;  %s315_s23 = smov 4  }
  0x12   :  { %22 = dma.hbm_to_vmem [thread:$0]  %s381_s0, 128, %s17_s13, [#allocation3], %s314_s22, %s314_s22, %s315_s23  }
  0x13   :  { %s316_s26 = smov [#allocation5]   ;;  %s263_s30 = scalar_lea.hbm %s382_s1, 1024 }
  0x14   :  { %s28_s27 = sshll.u32 %s316_s26, 4  ;;  %p264_p8 = scmp.ne.s32.totalorder %s382_s1, %s263_s30  ;;  %s29_s27 = int_to_ptr.vmem [resolvable:$true] %s28_s27 }
  0x15   :  { %p267_p9 = scmp.lt.u32.totalorder %s263_s30, %s382_s1 }
  0x17   :  { %p269_p10 = pnand %p267_p9, %p264_p8 }
  0x19   :  { %272 = shalt.err (!%p269_p10)
}
  0x1a   :  { %s273_s8 = scalar_lea.vmem %s29_s27, 1024  ;;  %p278_p12 = scmp.lt.s32.totalorder %s29_s27, %s29_s27 }
  0x1b   :  { %p274_p11 = scmp.ne.s32.totalorder %s29_s27, %s273_s8  ;;  %p279_p13 = scmp.lt.s32.totalorder %s273_s8, %s273_s8 }
  0x1d   :  { %p280_p0 = por %p279_p13, %p278_p12 }
  0x1f   :  { %p281_p1 = pnand %p280_p0, %p274_p11 }
  0x21   :  { %284 = shalt.err (!%p281_p1)
}
  0x22   :  { %34 = dma.hbm_to_vmem [thread:$0]  %s382_s1, 1024, %s29_s27, [#allocation6], %s314_s22, %s314_s22, %s315_s23  }
  0x23   :  { %307 = dma.done.wait [#allocation3], 128  }
  0x24   :  { %308 = vsyncadd [#allocation3], 4294967168 }
  0x25   :  { %309 = dma.done.wait [#allocation6], 1024  }
  0x26   :  { %310 = vsyncadd [#allocation6], 4294966272  ;;  %v317_v0 = vmov 0.0   ;;  %vm318_vm0 = vmmov 0   ;;  %v232_v1 = vld [vmem:[#allocation5] sm:$0xff]   ;;  %v233_v2 = vld [vmem:[#allocation5 + $0x8] sm:$0xff]  }
  0x27   :  { %203 = vmatprep.subr.bf16.mxu0 %v317_v0  ;;  %219 = vmatprep.mubr.msk.bf16.mxu0 %vm318_vm0, %v317_v0  ;;  %v234_v3 = vld [vmem:[#allocation5 + $0x10] sm:$0xff]   ;;  %v235_v4 = vld [vmem:[#allocation5 + $0x18] sm:$0xff]   ;;  %v236_v5 = vld [vmem:[#allocation5 + $0x20] sm:$0xff]   ;;  %s319_s11 = smov [#allocation7]  }
  0x28   :  { %204 = vmatpush3.bf16.msra.mxu0 %v232_v1  ;;  %v237_v6 = vld [vmem:[#allocation5 + $0x28] sm:$0xff]   ;;  %v238_v7 = vld [vmem:[#allocation5 + $0x30] sm:$0xff]   ;;  %v239_v8 = vld [vmem:[#allocation5 + $0x38] sm:$0xff]   ;;  %s171_s12 = sshll.u32 %s319_s11, 4  ;;  %s172_s12 = int_to_ptr.vmem [resolvable:$true] %s171_s12 }
  0x29   :  { %205 = vmatprep.subr.bf16.mxu0 %v317_v0  ;;  %v240_v9 = vld [vmem:[#allocation2] sm:$0xff]   ;;  %s285_s13 = scalar_lea.vmem %s172_s12, 256  ;;  %p290_p3 = scmp.lt.s32.totalorder %s172_s12, %s172_s12 }
  0x2a   :  { %v184_v10 = vld [vmem:[%s383_s2] ss:$0 sm:$0xff]  ;;  %p286_p2 = scmp.ne.s32.totalorder %s172_s12, %s285_s13  ;;  %p291_p4 = scmp.lt.s32.totalorder %s285_s13, %s285_s13 }
  0x2c   :  { %206 = vmatpush3.bf16.msra.mxu0 %v233_v2  ;;  %p292_p5 = por %p291_p4, %p290_p3 }
  0x2d   :  { %207 = vmatprep.subr.bf16.mxu0 %v317_v0 }
  0x2e   :  { %p293_p6 = pnand %p292_p5, %p286_p2 }
  0x30   :  { %208 = vmatpush3.bf16.msra.mxu0 %v234_v3 }
  0x31   :  { %209 = vmatprep.subr.bf16.mxu0 %v317_v0 }
  0x34   :  { %210 = vmatpush3.bf16.msra.mxu0 %v235_v4 }
  0x35   :  { %211 = vmatprep.subr.bf16.mxu0 %v317_v0 }
  0x38   :  { %212 = vmatpush3.bf16.msra.mxu0 %v236_v5 }
  0x39   :  { %213 = vmatprep.subr.bf16.mxu0 %v317_v0 }
  0x3c   :  { %214 = vmatpush3.bf16.msra.mxu0 %v237_v6 }
  0x3d   :  { %215 = vmatprep.subr.bf16.mxu0 %v317_v0 }
  0x40   :  { %216 = vmatpush3.bf16.msra.mxu0 %v238_v7 }
  0x41   :  { %217 = vmatprep.subr.bf16.mxu0 %v317_v0 }
  0x44   :  { %218 = vmatpush3.bf16.msra.mxu0 %v239_v8 }
  0x47   :  { %220 = vmatmul.mubr.bf16.vlgmr.msra.gmra.mrb[0].mxu0 %v240_v9 }
 0x11a   :  { %v157_v11 = vpop.f32.mrb[0].mxu0 }
 0x11b   :  { %v158_v12 = vadd.f32 %v184_v10, %v157_v11  ;;  %v221_v13 = vpop.f32.mrb[1].mxu0 }
 0x11c   :  { %v160_v14 = vpop.f32.mrb[2].mxu0 }
 0x11d   :  { %164 = vst [vmem:[#allocation7] sm:$0xff] %v158_v12  ;;  %v161_v15 = vadd.f32 %v184_v10, %v160_v14  ;;  %v222_v16 = vpop.f32.mrb[3].mxu0 }
 0x11f   :  { %165 = vst [vmem:[#allocation7 + $0x8] sm:$0xff] %v161_v15 }
 0x120   :  { %296 = shalt.err (!%p293_p6)
}
 0x121   :  { %s297_s15 = scalar_lea.hbm %s384_s3, 256 }
 0x122   :  { %p298_p7 = scmp.ne.s32.totalorder %s384_s3, %s297_s15  ;;  %p301_p8 = scmp.lt.u32.totalorder %s297_s15, %s384_s3 }
 0x124   :  { %p303_p9 = pnand %p301_p8, %p298_p7 }
 0x126   :  { %306 = shalt.err (!%p303_p9)
}
 0x127   :  { %s320_s20 = smov 128   ;;  %s321_s21 = smov 8  }
 0x128   :  { %177 = dma.vmem_to_hbm [thread:$0]  %s172_s12, 256, %s384_s3, [#allocation4], %s320_s20, %s320_s20, %s321_s21  }
 0x129   :  { %311 = dma.done.wait [#allocation4], 256  }
 0x12a   :  { %312 = vsyncadd [#allocation4], 4294967040 }
 0x12b   :  { %181 = vsyncpa [#allocation3], 1 }
 0x12c   :  { %182 = vsyncpa [#allocation6], 1 }
 0x12d   :  { %183 = vsyncpa [#allocation4], 1 }

</bundles_post_ra>
